<compile_context>
chip_gen: v6e
topology: v6e:2x2x1
jax: 0.10.0
libtpu: 0.0.40
codegen_flags: <defaults>
</compile_context>

<pallas_src>
import jax
import jax.numpy as jnp
from jax.experimental import pallas as pl
from jax.experimental.pallas import tpu as pltpu


def _normalize_kernel(sb_ref, x_ref, o_ref):
    # sb_ref: (2, C) f32 in SMEM -- row 0 = scale (1/std), row 1 = bias (-mean/std)
    # x_ref : (1, 1, S, L) input tile (any dtype; cast in-kernel)
    # o_ref : (1, 1, S, L) f32 output tile
    c = pl.program_id(1)
    x = x_ref[...].astype(jnp.float32)
    o_ref[...] = x * sb_ref[0, c] + sb_ref[1, c]


def _plane_view(h: int, w: int) -> tuple[int, int]:
    """(rows, lanes) view of one channel plane."""
    hw = h * w
    if hw % 128 == 0:
        return hw // 128, 128      # lane- and sublane-dense fast path
    return h, w                    # fallback: full W on the lane axis


def _pick_rows(rows: int, row_bytes: int, sublane: int,
               target_bytes: int = 4 * 1024 * 1024) -> int:
    """Rows per block: biggest legal tile <= target_bytes, preferring an exact
    divisor of `rows` so every tile is full (unmasked stores, no wasted DMA)."""
    max_rows = max(target_bytes // row_bytes, sublane)
    if rows <= max_rows:
        return rows                # full axis is always a legal block dim
    # Largest divisor of `rows` that is a multiple of `sublane`.
    for s in range(max_rows - max_rows % sublane, 0, -sublane):
        if rows % s == 0:
            return s
    # No such divisor: use a sublane-multiple block; the ragged last tile is
    # masked by Pallas (correct, slightly less efficient).
    return max(max_rows - max_rows % sublane, sublane)


def normalize(image: jax.Array, mean: jax.Array, std: jax.Array) -> jax.Array:
    """Pallas equivalent of (image - mean[None,:,None,None]) / std[None,:,None,None]."""
    N, C, H, W = image.shape
    mean = mean.astype(jnp.float32)
    std = std.astype(jnp.float32)

    # Hoist the divide: out = x * (1/std) + (-mean/std).
    scale_bias = jnp.stack([1.0 / std, -mean / std], axis=0)     # (2, C) f32

    R, L = _plane_view(H, W)
    x = image.reshape(N, C, R, L)                                # free row-major view

    # Sub-32-bit inputs pack along sublanes: keep S a multiple of the packing.
    sublane = 8 * max(4 // image.dtype.itemsize, 1)
    S = _pick_rows(R, L * 4, sublane)                            # f32 output rows dominate
    num_t = pl.cdiv(R, S)

    # v7x has two TensorCores per chip: never ship a single-block grid.
    if N * C * num_t < 2 and S % (2 * sublane) == 0:
        S //= 2
        num_t = pl.cdiv(R, S)

    out = pl.pallas_call(
        _normalize_kernel,
        out_shape=jax.ShapeDtypeStruct((N, C, R, L), jnp.float32),
        grid=(N, C, num_t),
        in_specs=[
            pl.BlockSpec(memory_space=pltpu.MemorySpace.SMEM),          # (2, C) scale/bias
            pl.BlockSpec((1, 1, S, L), lambda n, c, t: (n, c, t, 0)),   # image tile
        ],
        out_specs=pl.BlockSpec((1, 1, S, L), lambda n, c, t: (n, c, t, 0)),
        compiler_params=pltpu.CompilerParams(
            dimension_semantics=("parallel", "parallel", "parallel"),
            vmem_limit_bytes=32 * 1024 * 1024,
        ),
    )(scale_bias, x)

    return out.reshape(N, C, H, W)


if __name__ == "__main__":
    # Deterministic parameters (module __init__ takes mean/std lists of len C).
    C = 3
    mean = jnp.array([123.675, 116.28, 103.53], dtype=jnp.float32)
    std = jnp.array([58.395, 57.12, 57.375], dtype=jnp.float32)

    key = jax.random.PRNGKey(0)
    k1, k2 = jax.random.split(key)

    # Case 1: H*W % 128 == 0 -> lane/sublane-dense fast path.
    img1 = jax.random.uniform(k1, (2, C, 16, 16), dtype=jnp.float32) * 255.0
    # Case 2: H*W % 128 != 0 -> (H, W) fallback layout.
    img2 = jax.random.uniform(k2, (1, C, 24, 20), dtype=jnp.float32) * 255.0

    for img in (img1, img2):
        out = jax.block_until_ready(normalize(img, mean, std))
        ref = (img - mean[None, :, None, None]) / std[None, :, None, None]
        assert out.shape == img.shape and out.dtype == jnp.float32
        assert jnp.allclose(out, ref, atol=1e-5, rtol=1e-5)

    print("KERNEL_OK")
</pallas_src>

<mosaic_0001>
module attributes {stable_mosaic.version = 11 : i64} {
  func.func @_normalize_kernel(%arg0: i32, %arg1: i32, %arg2: i32, %arg3: memref<2x3xf32, #tpu.memory_space<smem>>, %arg4: memref<1x1x2x128xf32, #tpu.memory_space<vmem>>, %arg5: memref<1x1x2x128xf32, #tpu.memory_space<vmem>>) attributes {dimension_semantics = [#tpu.dimension_semantics<parallel>, #tpu.dimension_semantics<parallel>, #tpu.dimension_semantics<parallel>], iteration_bounds = array<i64: 2, 3, 1>, scalar_prefetch = 0 : i64, scratch_operands = 0 : i64, tpu.core_type = #tpu.core_type<tc>, window_params = [{transform_indices = @transform_0, window_bounds = array<i64: 2, 3>}, {transform_indices = @transform_1, window_bounds = array<i64: 1, 1, 2, 128>}, {transform_indices = @transform_2, window_bounds = array<i64: 1, 1, 2, 128>}]} {
    %c0 = arith.constant 0 : index
    %c0_0 = arith.constant 0 : index
    %c0_1 = arith.constant 0 : index
    %c0_2 = arith.constant 0 : index
    %0 = vector.load %arg4[%c0, %c0_0, %c0_1, %c0_2] : memref<1x1x2x128xf32, #tpu.memory_space<vmem>>, vector<1x1x2x128xf32>
    %c0_3 = arith.constant 0 : index
    %1 = arith.index_cast %arg1 : i32 to index
    %2 = memref.load %arg3[%c0_3, %1] : memref<2x3xf32, #tpu.memory_space<smem>>
    %3 = vector.broadcast %2 : f32 to vector<1x1x2x128xf32>
    %4 = arith.mulf %0, %3 : vector<1x1x2x128xf32>
    %c1 = arith.constant 1 : index
    %5 = arith.index_cast %arg1 : i32 to index
    %6 = memref.load %arg3[%c1, %5] : memref<2x3xf32, #tpu.memory_space<smem>>
    %7 = vector.broadcast %6 : f32 to vector<1x1x2x128xf32>
    %8 = arith.addf %4, %7 : vector<1x1x2x128xf32>
    %c0_4 = arith.constant 0 : index
    %c0_5 = arith.constant 0 : index
    %c0_6 = arith.constant 0 : index
    %c0_7 = arith.constant 0 : index
    %9 = vector.load %arg5[%c0_4, %c0_5, %c0_6, %c0_7] : memref<1x1x2x128xf32, #tpu.memory_space<vmem>>, vector<1x1x2x128xf32>
    tpu.vector_store %arg5[%c0_4, %c0_5, %c0_6, %c0_7], %8 {strides = array<i32>} : memref<1x1x2x128xf32, #tpu.memory_space<vmem>>, vector<1x1x2x128xf32>,
    return
  }
  func.func @transform_0(%arg0: i32, %arg1: i32, %arg2: i32) -> (i32, i32) {
    %c0_i32 = arith.constant 0 : i32
    %c0_i32_0 = arith.constant 0 : i32
    %c0_i32_1 = arith.constant 0 : i32
    return %c0_i32, %c0_i32_0 : i32, i32
  }
  func.func @transform_1(%arg0: i32, %arg1: i32, %arg2: i32) -> (i32, i32, i32, i32) {
    %c0_i32 = arith.constant 0 : i32
    %c0_i32_0 = arith.constant 0 : i32
    return %arg0, %arg1, %arg2, %c0_i32 : i32, i32, i32, i32
  }
  func.func @transform_2(%arg0: i32, %arg1: i32, %arg2: i32) -> (i32, i32, i32, i32) {
    %c0_i32 = arith.constant 0 : i32
    %c0_i32_0 = arith.constant 0 : i32
    return %arg0, %arg1, %arg2, %c0_i32 : i32, i32, i32, i32
  }
}

</mosaic_0001>

<bundles_post_ra>
// kernel: tpu_custom_call.1
= control target key start
LH: loop header
LB: loop body
LE: loop exit
PB: predicated region body
PF: predicated region fallthrough
CT: control target
= control target key end

     0   :  { %s795_s0 = inlined_call_operand.hbm [shape: f32[2,3], index: 0, kind: input, shape index: {}]   ;;  %s796_s1 = inlined_call_operand.hbm [shape: f32[2,3,2,128], index: 1, kind: input, shape index: {}]   ;;  %s797_s2 = inlined_call_operand.hbm [shape: f32[2,3,2,128], index: 2, kind: output, shape index: {}]  }
   0x1   :  { %802 = sst [smem:[#allocation14_spill]] %s795_s0 }
   0x2   :  { %7 = vsyncpa [#allocation5], 0 }
   0x3   :  { %8 = vsyncpa [#allocation3], 0 }
   0x4   :  { %10 = vsyncpa [#allocation3 + $0x1], 0 }
   0x5   :  { %11 = vsyncpa [#allocation4], 0 }
   0x6   :  { %13 = vsyncpa [#allocation4 + $0x1], 0  ;;  %s603_s9 = smov 0   ;;  %s605_s10 = smov 0  }
   0x7   :  { %s607_s11 = smov 0   ;;  %s609_s12 = smov 0  }
   0x8   :  { %s611_s13 = smov 0   ;;  %s613_s14 = smov 0  }
   0x9   :  { %s615_s15 = smov 0   ;;  %s617_s16 = smov 0  }
   0xa LB: > { %s335_s17 = sadd.s32 4294967295, %s583_s16   ;;  %s336_s18 = sadd.s32 4294967294, %s583_s16   ;;  %s583_s16 = sphi %s617_s16, %s19_s16   ;;  %s579_s15 = sphi %s615_s15, %s826_s15   ;;  %s575_s14 = sphi %s613_s14, %s825_s14   ;;  %s571_s13 = sphi %s611_s13, %s824_s13   ;;  %s567_s12 = sphi %s609_s12, %s823_s12   ;;  %s563_s11 = sphi %s607_s11, %s822_s11   ;;  %s559_s10 = sphi %s605_s10, %s821_s10   ;;  %s555_s9 = sphi %s603_s9, %s820_s9  }
   0xb   : > { %p83_p0 = scmp.ne.s32.totalorder %s559_s10, %s555_s9  ;;  %p647_p1 = scmp.eq.s32.totalorder %s335_s17, 0 }
   0xc   : > { %p651_p2 = scmp.eq.s32.totalorder %s335_s17, 5  ;;  %p117_p3 = scmp.eq.s32.totalorder %s336_s18, 5 }
   0xd   : > { %p657_p4 = por %p647_p1, %p83_p0  ;;  %p337_p5 = scmp.ge.s32.totalorder %s583_s16, 1 }
   0xe   : > { %p662_p6 = por %p117_p3, %p83_p0  ;;  %p124_p7 = scmp.lt.s32.totalorder %s583_s16, 7 }
   0xf   : > { %s34_s24 = sadd.s32 1, %s575_s14  ;;  %s38_s25 = sadd.s32 1, %s579_s15 }
  0x10   : > { %s806_s22 = scalar_select %p662_p6, 1, 0 }
  0x11   : > { %p667_p8 = pnand %p337_p5, %p124_p7  ;;  %p36_p11 = scmp.ge.s32.totalorder %s34_s24, 3 }
  0x12   : > { %807 = sst [smem:[#allocation11_spill]] %s806_s22  ;;  %s585_s26 = smov [#allocation2]  }
  0x13   : > { %p363_p9 = pneg %p667_p8  ;;  %s809_s0 = sld [smem:[#allocation14_spill]] }
  0x14   : > { %s828_s24 = smov (%p36_p11, %s34_s24), 0  ;;  %s830_s25 = smov (!%p36_p11, %s38_s25), %s579_s15 }
  0x15   : > { %p364_p10 = pnand %p363_p9, %p647_p1  ;;  %810 = sst [smem:[#allocation12_spill]] %s828_s24 }
  0x16   : > { %s64_s29 = ssub.s32 %s575_s14, %s828_s24  ;;  %s70_s30 = sadd.s32 1, %s563_s11 }
  0x17   : > { %p40_p12 = scmp.ge.s32.totalorder %s830_s25, 2  ;;  %p77_p13 = scmp.ne.s32.totalorder %s563_s11, %s559_s10 }
  0x18   : > { %p78_p0 = scmp.eq.s32.totalorder %s583_s16, 0  ;;  %p376_p3 = scmp.lt.s32.totalorder %s583_s16, 6 }
  0x19   : > { %366 = dma.hbm_to_smem (!%p364_p10), %s809_s0, 32, %s585_s26, [#allocation5]  }
  0x1a   : > { %s832_s25 = smov (%p40_p12, %s830_s25), 0  ;;  %p692_p5 = por %p78_p0, %p77_p13 }
  0x1b   : > { %811 = sst [smem:[#allocation13_spill]] %s832_s25  ;;  %p698_p7 = por %p651_p2, %p77_p13 }
  0x1c   : > { %s63_s5 = ssub.s32 %s579_s15, %s832_s25  ;;  %s146_s6 = sand.u32 1, %s563_s11  }
  0x1d   : > { %s813_s4 = scalar_select %p698_p7, 1, 0 }
  0x1e   : > { %s65_s7 = sor.u32 %s64_s29, %s63_s5  ;;  %s340_s8 = sshll.u32 %s146_s6, 1 }
  0x1f   : > { %p68_p9 = scmp.eq.s32.totalorder %s65_s7, 0  ;;  %s353_s17 = smul.u32 3, %s579_s15 }
  0x20   : > { %s150_s27 = scalar_lea.vmem [#allocation6], %s340_s8  ;;  %p717_p2 = pnand %p376_p3, %p692_p5 }
  0x21   : > { %s707_s18 = scalar_select %p68_p9, %s563_s11, %s70_s30  }
  0x22   : > { %s156_s26 = sadd.s32 %s575_s14, %s353_s17  ;;  %s160_s28 = sshll.u32 %s150_s27, 4  ;;  %s161_s28 = int_to_ptr.vmem [resolvable:$true] %s160_s28 }
  0x23   : > { %s341_s0 = sshll.u32 %s156_s26, 5  ;;  %s147_s29 = scalar_lea.sflag [#allocation3], %s146_s6 }
  0x24   : > { %s158_s22 = scalar_lea.hbm %s796_s1, %s341_s0  ;;  %p457_p10 = pneg %p717_p2 }
  0x25   : > { %s468_s30 = scalar_lea.vmem %s161_s28, 32  ;;  %s586_s5 = smov [#allocation6]  }
  0x26   : > { %p469_p11 = scmp.ne.s32.totalorder %s161_s28, %s468_s30  ;;  %s473_s7 = sshll.u32 %s586_s5, 4  ;;  %s474_s7 = int_to_ptr.vmem [resolvable:$false] %s473_s7 }
  0x27   : > { %s475_s8 = scalar_lea.vmem %s474_s7, 64  ;;  %p476_p0 = scmp.lt.s32.totalorder %s161_s28, %s474_s7 }
  0x28   : > { %p471_p12 = pnand %p469_p11, %p457_p10  ;;  %p477_p9 = scmp.lt.s32.totalorder %s475_s8, %s468_s30 }
  0x2a   : > { %p472_p13 = pneg %p471_p12  ;;  %p478_p6 = por %p477_p9, %p476_p0 }
  0x2c   : > { %p479_p7 = pnand %p478_p6, %p472_p13 }
  0x2e   : > { %482 = shalt.err (!%p479_p7)
}
  0x2f   : > { %370 = dma.hbm_to_vmem [thread:$0]  (!%p717_p2), %s158_s22, 32, %s161_s28, %s147_s29  }
  0x30   : > { %169 = sbr.rel (%p667_p8) target bundleno = 89 (0x59), region = 28 }
  0x35   : > { %542 = dma.done.wait (%p647_p1), [#allocation5], 32  }
  0x36   : > { %544 = vsyncadd (%p647_p1), [#allocation5], 4294967264  ;;  %s732_s0 = sand.u32 1, %s559_s10  }
  0x37   : > { %s344_s24 = sshll.u32 %s732_s0, 1  ;;  %s176_s3 = scalar_lea.sflag [#allocation3], %s732_s0 }
  0x38   : > { %s179_s6 = scalar_lea.vmem [#allocation6], %s344_s24 }
  0x39   : > { %546 = dma.done.wait (%p657_p4), %s176_s3, 32  }
  0x3a   : > { %548 = vsyncadd (%p657_p4), %s176_s3, 4294967264 }
  0x3b   : > { %184 = sfence }
  0x3c   : > { %s202_s19 = sld [smem:[#allocation2 + %s567_s12]]  ;;  %s205_s22 = sshra.s32 %s567_s12, 7  ;;  %v201_v0 = vld [vmem:[%s179_s6] sm:$0x3] }
  0x3d   : > { %s210_s23 = sand.u32 127, %s567_s12  ;;  %s351_s25 = sshll.u32 %s205_s22, 7 }
  0x3e   : > { %s352_s17 = sadd.s32 128, %s351_s25  ;;  %s354_s28 = smul.u32 3, %s571_s13 }
  0x3f   : > { %s211_s26 = sadd.s32 %s352_s17, %s210_s23  ;;  %s200_s20 = scalar_lea.vmem [#allocation7], %s344_s24 }
  0x40   : > { %s212_s27 = sld [smem:[#allocation2 + %s211_s26]]  ;;  %s229_s21 = sadd.s32 %s567_s12, %s354_s28 }
  0x41   : > { %s233_s29 = sshll.u32 %s200_s20, 4  ;;  %s348_s30 = sshll.u32 %s229_s21, 5  ;;  %s745_s29 = int_to_ptr.vmem [resolvable:$true] %s233_s29 }
  0x42   : > { %v203_v1 = vstv %s202_s19  ;;  %s231_s8 = scalar_lea.hbm %s797_s2, %s348_s30  ;;  %s217_s3 = scalar_lea.sflag [#allocation4], %s732_s0 }
  0x43   : > { %v204_v2 = vmul.f32 %v203_v1, %v201_v0  ;;  %s483_s13 = scalar_lea.vmem %s745_s29, 32  ;;  %p815_p4 = scmp.ne.s32.totalorder %s813_s4, 0 }
  0x44   : > { %p484_p1 = scmp.ne.s32.totalorder %s745_s29, %s483_s13  ;;  %s587_s12 = smov [#allocation7]  }
  0x45   : > { %s487_s24 = sshll.u32 %s587_s12, 4  ;;  %s488_s24 = int_to_ptr.vmem [resolvable:$false] %s487_s24 }
  0x46   : > { %v213_v3 = vstv %s212_s27  ;;  %p485_p6 = pnand %p484_p1, %p815_p4  ;;  %s489_s6 = scalar_lea.vmem %s488_s24, 64 }
  0x47   : > { %v214_v4 = vadd.f32 %v213_v3, %v204_v2  ;;  %p490_p3 = scmp.lt.s32.totalorder %s745_s29, %s488_s24  ;;  %p491_p5 = scmp.lt.s32.totalorder %s489_s6, %s483_s13 }
  0x48   : > { %p486_p8 = pneg %p485_p6 }
  0x49   : > { %215 = vst [vmem:[%s200_s20] sm:$0x3] %v214_v4  ;;  %p492_p7 = por %p491_p5, %p490_p3 }
  0x4b   : > { %p493_p2 = pnand %p492_p7, %p486_p8 }
  0x4d   : > { %496 = shalt.err (!%p493_p2)
}
  0x4e   : > { %s497_s19 = scalar_lea.hbm %s231_s8, 32  ;;  %s501_s23 = scalar_lea.hbm %s797_s2, 192 }
  0x4f   : > { %p498_p10 = scmp.ne.s32.totalorder %s231_s8, %s497_s19  ;;  %p502_p13 = scmp.lt.s32.totalorder %s231_s8, %s797_s2 }
  0x50   : > { %p503_p0 = scmp.lt.s32.totalorder %s501_s23, %s497_s19 }
  0x51   : > { %p499_p11 = pnand %p498_p10, %p815_p4 }
  0x52   : > { %p504_p9 = por %p503_p0, %p502_p13 }
  0x53   : > { %p500_p12 = pneg %p499_p11 }
  0x55   : > { %p505_p1 = pnand %p504_p9, %p500_p12 }
  0x57   : > { %508 = shalt.err (!%p505_p1)
}
  0x58   : > { %361 = dma.vmem_to_hbm [thread:$0]  (%p815_p4), %s745_s29, 32, %s231_s8, %s217_s3  }
  0x59 PF: > { %s816_s26 = sld [smem:[#allocation11_spill]]  ;;  %p378_p6 = scmp.ge.s32.totalorder %s583_s16, 2 }
  0x5a   : > { %s245_s27 = sand.u32 1, %s555_s9  }
  0x5b   : > { %s246_s28 = scalar_lea.sflag [#allocation4], %s245_s27 }
  0x5f   : > { %p817_p8 = scmp.ne.s32.totalorder %s816_s26, 0 }
  0x61   : > { %p372_p3 = pnand %p378_p6, %p817_p8 }
  0x63   : > { %p373_p5 = pneg %p372_p3 }
  0x65   : > { %550 = dma.done.wait (%p373_p5), %s246_s28, 32  }
  0x66   : > { %552 = vsyncadd (%p373_p5), %s246_s28, 4294967264  ;;  %s19_s16 = sadd.s32 1, %s583_s16   ;;  %s818_s4 = sld [smem:[#allocation12_spill]] }
  0x67   : > { %p16_p7 = scmp.ge.s32.totalorder %s19_s16, 8   ;;  %s819_s21 = sld [smem:[#allocation13_spill]] }
  0x68   : > { %s820_s9 = smov %s559_s10  ;;  %s821_s10 = smov %s563_s11 }
  0x69   : > { %s822_s11 = smov %s707_s18  ;;  %s823_s12 = smov %s575_s14 }
  0x6a   : > { %s824_s13 = smov %s579_s15  ;;  %18 = sbr.rel (!%p16_p7) target bundleno = 10 (0xa), region = 78 }
  0x6c   : > { %s825_s14 = smov %s818_s4 }
  0x6d   : > { %s826_s15 = smov %s819_s21 }
  0x6f   :  { %251 = vsyncpa [#allocation3], 1 }
  0x70   :  { %253 = vsyncpa [#allocation3 + $0x1], 1 }
  0x71   :  { %254 = vsyncpa [#allocation4], 1 }
  0x72   :  { %256 = vsyncpa [#allocation4 + $0x1], 1 }
  0x73   :  { %257 = vsyncpa [#allocation5], 1 }
  0x74   :  { %259 = vsyncpa [#allocation5 + $0x1], 1 }

</bundles_post_ra>
